<compile_context>
chip_gen: v7x
topology: tpu7x:2x2x1
jax: 0.10.0
libtpu: 0.0.40
codegen_flags: <defaults>
</compile_context>

<pallas_src>
import jax
import jax.numpy as jnp
from jax.experimental import pallas as pl
from jax.experimental.pallas import tpu as pltpu


def _make_postprocess_kernel(img_h, img_w):
    """Build the kernel with the (static) image size folded in as constants."""
    img_h = float(img_h)
    img_w = float(img_w)

    def kernel(logits_ref, boxes_ref, boxes_out_ref, scores_ref):
        # scores = sigmoid(logits[:, 0]); kept as an (N, 1) column (lane 0).
        scores_ref[...] = jax.nn.sigmoid(logits_ref[:, 0:1])

        # box_cxcywh_to_xyxy + image scaling, two lanes at a time.
        b = boxes_ref[...]                  # (N, 4): cx, cy, w, h
        cxcy = b[:, 0:2]                    # (N, 2)
        wh = b[:, 2:4]                      # (N, 2)

        # Per-lane scale [img_w, img_h]; constants fold at compile time.
        lane = jax.lax.broadcasted_iota(jnp.int32, cxcy.shape, 1)
        scale = jnp.where(lane == 0, img_w, img_h).astype(jnp.float32)

        cxcy_s = cxcy * scale
        half_wh_s = wh * (0.5 * scale)

        boxes_out_ref[:, 0:2] = cxcy_s - half_wh_s   # x_min, y_min
        boxes_out_ref[:, 2:4] = cxcy_s + half_wh_s   # x_max, y_max

    return kernel


def tracker_post_process(pred_logits, pred_boxes, target_size):
    """pred_logits: [N, C] f32, pred_boxes: [N, 4] f32 (cx, cy, w, h),
    target_size: static (img_h, img_w).
    Returns (boxes [N, 4] xyxy scaled, scores [N], labels [N])."""
    n, _ = pred_logits.shape
    assert pred_boxes.shape == (n, 4)

    img_h = float(target_size[0])
    img_w = float(target_size[1])

    boxes, scores_nx1 = pl.pallas_call(
        _make_postprocess_kernel(img_h, img_w),
        out_shape=(
            jax.ShapeDtypeStruct((n, 4), jnp.float32),   # boxes (xyxy, scaled)
            jax.ShapeDtypeStruct((n, 1), jnp.float32),   # scores column
        ),
        in_specs=[
            pl.BlockSpec(memory_space=pltpu.VMEM),   # logits [N, C]
            pl.BlockSpec(memory_space=pltpu.VMEM),   # boxes  [N, 4]
        ],
        out_specs=(
            pl.BlockSpec(memory_space=pltpu.VMEM),
            pl.BlockSpec(memory_space=pltpu.VMEM),
        ),
    )(jnp.asarray(pred_logits, jnp.float32), jnp.asarray(pred_boxes, jnp.float32))

    scores = scores_nx1.reshape(n)
    # labels = torch.full_like(scores, 0): constant, no kernel work needed.
    labels = jnp.zeros((n,), jnp.float32)
    return boxes, scores, labels


def _reference(pred_logits, pred_boxes, target_size):
    scores = jax.nn.sigmoid(pred_logits[..., 0])
    cx, cy, w, h = jnp.split(pred_boxes, 4, axis=-1)
    boxes = jnp.concatenate(
        [cx - 0.5 * w, cy - 0.5 * h, cx + 0.5 * w, cy + 0.5 * h], axis=-1)
    img_h, img_w = target_size
    scale_fct = jnp.asarray([img_w, img_h, img_w, img_h], jnp.float32)
    boxes = boxes * scale_fct[None, :]
    labels = jnp.zeros_like(scores)
    return boxes, scores, labels


if __name__ == "__main__":
    key = jax.random.PRNGKey(0)
    k1, k2 = jax.random.split(key)

    N = 256      # number of track queries
    C = 4        # number of classes (MOTRv2 scores only class 0)
    pred_logits = jax.random.normal(k1, (N, C), dtype=jnp.float32)
    pred_boxes = jax.nn.sigmoid(jax.random.normal(k2, (N, 4), dtype=jnp.float32))
    target_size = (480.0, 640.0)   # (img_h, img_w)

    boxes, scores, labels = tracker_post_process(pred_logits, pred_boxes, target_size)
    jax.block_until_ready((boxes, scores, labels))

    ref_boxes, ref_scores, ref_labels = _reference(pred_logits, pred_boxes, target_size)
    assert jnp.allclose(boxes, ref_boxes, atol=1e-4, rtol=1e-4)
    assert jnp.allclose(scores, ref_scores, atol=1e-6, rtol=1e-6)
    assert jnp.allclose(labels, ref_labels)

    print("KERNEL_OK")
</pallas_src>

<mosaic_0001>
module attributes {stable_mosaic.version = 11 : i64} {
  func.func @kernel(%arg0: memref<256x4xf32, #tpu.memory_space<vmem>>, %arg1: memref<256x4xf32, #tpu.memory_space<vmem>>, %arg2: memref<256x4xf32, #tpu.memory_space<vmem>>, %arg3: memref<256x1xf32, #tpu.memory_space<vmem>>) attributes {dimension_semantics = [], scalar_prefetch = 0 : i64, scratch_operands = 0 : i64, tpu.core_type = #tpu.core_type<tc>} {
    %c0 = arith.constant 0 : index
    %c0_0 = arith.constant 0 : index
    %0 = vector.load %arg0[%c0, %c0_0] : memref<256x4xf32, #tpu.memory_space<vmem>>, vector<256x1xf32>
    %1 = arith.negf %0 : vector<256x1xf32>
    %2 = math.exp %1 : vector<256x1xf32>
    %cst = arith.constant 1.000000e+00 : f32
    %3 = vector.broadcast %cst : f32 to vector<256x1xf32>
    %4 = arith.addf %3, %2 : vector<256x1xf32>
    %5 = arith.divf %3, %4 : vector<256x1xf32>
    %c0_1 = arith.constant 0 : index
    %c0_2 = arith.constant 0 : index
    %6 = vector.load %arg3[%c0_1, %c0_2] : memref<256x1xf32, #tpu.memory_space<vmem>>, vector<256x1xf32>
    tpu.vector_store %arg3[%c0_1, %c0_2], %5 {strides = array<i32>} : memref<256x1xf32, #tpu.memory_space<vmem>>, vector<256x1xf32>,
    %c0_3 = arith.constant 0 : index
    %c0_4 = arith.constant 0 : index
    %7 = vector.load %arg1[%c0_3, %c0_4] : memref<256x4xf32, #tpu.memory_space<vmem>>, vector<256x4xf32>
    %8 = vector.extract_strided_slice %7 {offsets = [0, 0], sizes = [256, 2], strides = [1, 1]} : vector<256x4xf32> to vector<256x2xf32>
    %9 = vector.extract_strided_slice %7 {offsets = [0, 2], sizes = [256, 2], strides = [1, 1]} : vector<256x4xf32> to vector<256x2xf32>
    %10 = tpu.iota {dimensions = array<i32: 1>} : vector<256x2xi32>
    %c0_i32 = arith.constant 0 : i32
    %11 = vector.broadcast %c0_i32 : i32 to vector<256x2xi32>
    %12 = arith.cmpi eq, %10, %11 : vector<256x2xi32>
    %cst_5 = arith.constant 6.400000e+02 : f32
    %cst_6 = arith.constant 4.800000e+02 : f32
    %13 = vector.broadcast %cst_5 : f32 to vector<256x2xf32>
    %14 = vector.broadcast %cst_6 : f32 to vector<256x2xf32>
    %15 = arith.select %12, %13, %14 : vector<256x2xi1>, vector<256x2xf32>
    %16 = arith.mulf %8, %15 : vector<256x2xf32>
    %cst_7 = arith.constant 5.000000e-01 : f32
    %17 = vector.broadcast %cst_7 : f32 to vector<256x2xf32>
    %18 = arith.mulf %17, %15 : vector<256x2xf32>
    %19 = arith.mulf %9, %18 : vector<256x2xf32>
    %20 = arith.subf %16, %19 : vector<256x2xf32>
    %c0_8 = arith.constant 0 : index
    %c0_9 = arith.constant 0 : index
    %21 = vector.load %arg2[%c0_8, %c0_9] : memref<256x4xf32, #tpu.memory_space<vmem>>, vector<256x2xf32>
    tpu.vector_store %arg2[%c0_8, %c0_9], %20 {strides = array<i32>} : memref<256x4xf32, #tpu.memory_space<vmem>>, vector<256x2xf32>,
    %22 = arith.addf %16, %19 : vector<256x2xf32>
    %c0_10 = arith.constant 0 : index
    %c2 = arith.constant 2 : index
    %23 = vector.load %arg2[%c0_10, %c2] : memref<256x4xf32, #tpu.memory_space<vmem>>, vector<256x2xf32>
    tpu.vector_store %arg2[%c0_10, %c2], %22 {strides = array<i32>} : memref<256x4xf32, #tpu.memory_space<vmem>>, vector<256x2xf32>,
    return
  }
}

</mosaic_0001>

<bundles_post_ra>
// kernel: tpu_custom_call.1
= control target key start
LH: loop header
LB: loop body
LE: loop exit
PB: predicated region body
PF: predicated region fallthrough
CT: control target
= control target key end

     0   :  { %v302_v0 = vlaneseq  ;;  %v932_v2 = vmov 480.0   ;;  %s933_s12 = smov 2   ;;  %s934_s21 = smov 126   ;;  %vm535_vm1 = vcmask 15360   ;;  %vm237_vm2 = vcmask 7168   ;;  %s1868_s1 = inlined_call_operand.vmem [shape: f32[256,4], index: 1, kind: input, shape index: {}]   ;;  %s1869_s2 = inlined_call_operand.vmem [shape: f32[256,4], index: 2, kind: output, shape index: {0}]   ;;  %s1870_s0 = inlined_call_operand.vmem [shape: f32[256,4], index: 0, kind: input, shape index: {}]   ;;  %s1871_s3 = inlined_call_operand.vmem [shape: f32[256,1], index: 3, kind: output, shape index: {1}]  }
   0x1   :  { %v962_v5 = vld [vmem:[%s1868_s1 + $0x8] sm:$0xff]  ;;  %v967_v6 = vld [vmem:[%s1868_s1] sm:$0xff]  ;;  %v978_v10 = vld [vmem:[%s1868_s1 + $0x10] sm:$0xff]  ;;  %vm728_vm3 = vcmask 31760  }
   0x2   :  { %v303_v1 = vand.u32 127, %v302_v0  ;;  %v983_v11 = vld [vmem:[%s1868_s1 + $0x18] sm:$0xff]  ;;  %v994_v14 = vld [vmem:[%s1868_s1 + $0x20] sm:$0xff]  ;;  %v999_v15 = vld [vmem:[%s1868_s1 + $0x28] sm:$0xff] }
   0x3   :  { %v1010_v18 = vld [vmem:[%s1868_s1 + $0x30] sm:$0xff]  ;;  %v1015_v19 = vld [vmem:[%s1868_s1 + $0x38] sm:$0xff]  ;;  %v1026_v22 = vld [vmem:[%s1868_s1 + $0x40] sm:$0xff] }
   0x4   :  { %vm304_vm0 = vcmp.eq.s32.totalorder %v303_v1, 0  ;;  %v1031_v23 = vld [vmem:[%s1868_s1 + $0x48] sm:$0xff]  ;;  %v1042_v26 = vld [vmem:[%s1868_s1 + $0x50] sm:$0xff]  ;;  %v1047_v27 = vld [vmem:[%s1868_s1 + $0x58] sm:$0xff] }
   0x5   :  { %v955_v3 = vsel %vm304_vm0, 640.0, %v932_v2  ;;  %v1058_v30 = vld [vmem:[%s1868_s1 + $0x60] sm:$0xff]  ;;  %v1063_v31 = vld [vmem:[%s1868_s1 + $0x68] sm:$0xff]  ;;  %v1074_v34 = vld [vmem:[%s1868_s1 + $0x70] sm:$0xff] }
   0x6   :  { %v338_v4 = vmul.f32 0.5, %v955_v3  ;;  %v1079_v35 = vld [vmem:[%s1868_s1 + $0x78] sm:$0xff]  ;;  %v1090_v38 = vld [vmem:[%s1868_s1 + $0x80] sm:$0xff]  ;;  %v1095_v39 = vld [vmem:[%s1868_s1 + $0x88] sm:$0xff] }
   0x7   :  { %v1106_v42 = vld [vmem:[%s1868_s1 + $0x90] sm:$0xff]  ;;  %v1111_v43 = vld [vmem:[%s1868_s1 + $0x98] sm:$0xff]  ;;  %v1122_v46 = vld [vmem:[%s1868_s1 + $0xa0] sm:$0xff] }
   0x8   :  { %340 = vrot.lane.b32.xlu0 %v338_v4, %s933_s12  ;;  %v1127_v47 = vld [vmem:[%s1868_s1 + $0xa8] sm:$0xff]  ;;  %v1138_v50 = vld [vmem:[%s1868_s1 + $0xb0] sm:$0xff]  ;;  %v1143_v51 = vld [vmem:[%s1868_s1 + $0xb8] sm:$0xff] }
   0x9   :  { %v1154_v54 = vld [vmem:[%s1868_s1 + $0xc0] sm:$0xff]  ;;  %v1159_v55 = vld [vmem:[%s1868_s1 + $0xc8] sm:$0xff]  ;;  %v1170_v58 = vld [vmem:[%s1868_s1 + $0xd0] sm:$0xff] }
   0xa   :  { %v1175_v59 = vld [vmem:[%s1868_s1 + $0xd8] sm:$0xff]  ;;  %v1186_v62 = vld [vmem:[%s1868_s1 + $0xe0] sm:$0xff]  ;;  %v1191_v63 = vld [vmem:[%s1868_s1 + $0xe8] sm:$0xff] }
   0xb   :  { %v1202_v2 = vld [vmem:[%s1868_s1 + $0xf0] sm:$0xff]  ;;  %v1207_v4 = vld [vmem:[%s1868_s1 + $0xf8] sm:$0xff] }
  0x7a   :  { %v969_v7 = vpop.permute.xlu0 %340 }
  0x7b   :  { %v344_v8 = vmul.f32 %v969_v7, %v962_v5  ;;  %v343_v9 = vmul.f32 %v969_v7, %v967_v6  ;;  %v345_v12 = vmul.f32 %v969_v7, %v978_v10  ;;  %v346_v13 = vmul.f32 %v969_v7, %v983_v11 }
  0x7c   :  { %v347_v16 = vmul.f32 %v969_v7, %v994_v14  ;;  %v348_v17 = vmul.f32 %v969_v7, %v999_v15  ;;  %v349_v20 = vmul.f32 %v969_v7, %v1010_v18  ;;  %v350_v21 = vmul.f32 %v969_v7, %v1015_v19 }
  0x7d   :  { %409 = vrot.lane.b32.xlu1 %v344_v8, %s934_s21  ;;  %407 = vrot.lane.b32.xlu0 %v343_v9, %s934_s21  ;;  %v351_v24 = vmul.f32 %v969_v7, %v1026_v22  ;;  %v352_v25 = vmul.f32 %v969_v7, %v1031_v23  ;;  %v353_v28 = vmul.f32 %v969_v7, %v1042_v26 }
  0x7e   :  { %v354_v29 = vmul.f32 %v969_v7, %v1047_v27  ;;  %v355_v32 = vmul.f32 %v969_v7, %v1058_v30  ;;  %v356_v33 = vmul.f32 %v969_v7, %v1063_v31  ;;  %v357_v36 = vmul.f32 %v969_v7, %v1074_v34 }
  0x7f   :  { %v358_v37 = vmul.f32 %v969_v7, %v1079_v35  ;;  %v359_v40 = vmul.f32 %v969_v7, %v1090_v38  ;;  %v360_v41 = vmul.f32 %v969_v7, %v1095_v39  ;;  %v361_v44 = vmul.f32 %v969_v7, %v1106_v42 }
  0x80   :  { %v362_v45 = vmul.f32 %v969_v7, %v1111_v43  ;;  %v363_v48 = vmul.f32 %v969_v7, %v1122_v46  ;;  %v364_v49 = vmul.f32 %v969_v7, %v1127_v47  ;;  %v365_v52 = vmul.f32 %v969_v7, %v1138_v50 }
  0x81   :  { %411 = vrot.lane.b32.xlu1 %v345_v12, %s934_s21  ;;  %413 = vrot.lane.b32.xlu0 %v346_v13, %s934_s21  ;;  %v366_v53 = vmul.f32 %v969_v7, %v1143_v51  ;;  %v367_v56 = vmul.f32 %v969_v7, %v1154_v54  ;;  %v368_v57 = vmul.f32 %v969_v7, %v1159_v55 }
  0x82   :  { %v369_v60 = vmul.f32 %v969_v7, %v1170_v58  ;;  %v370_v61 = vmul.f32 %v969_v7, %v1175_v59  ;;  %v371_v0 = vmul.f32 %v969_v7, %v1186_v62  ;;  %v372_v1 = vmul.f32 %v969_v7, %v1191_v63 }
  0x83   :  { %v373_v8 = vmul.f32 %v969_v7, %v1202_v2  ;;  %v374_v9 = vmul.f32 %v969_v7, %v1207_v4  ;;  %v307_v12 = vmul.f32 %v955_v3, %v962_v5  ;;  %v306_v13 = vmul.f32 %v955_v3, %v967_v6 }
  0x85   :  { %415 = vrot.lane.b32.xlu1 %v347_v16, %s934_s21  ;;  %417 = vrot.lane.b32.xlu0 %v348_v17, %s934_s21 }
  0x89   :  { %419 = vrot.lane.b32.xlu1 %v349_v20, %s934_s21  ;;  %421 = vrot.lane.b32.xlu0 %v350_v21, %s934_s21  ;;  %v308_v20 = vmul.f32 %v955_v3, %v978_v10  ;;  %v309_v21 = vmul.f32 %v955_v3, %v983_v11  ;;  %v310_v10 = vmul.f32 %v955_v3, %v994_v14 }
  0x8a   :  { %v311_v11 = vmul.f32 %v955_v3, %v999_v15 }
  0x8d   :  { %423 = vrot.lane.b32.xlu1 %v351_v24, %s934_s21  ;;  %425 = vrot.lane.b32.xlu0 %v352_v25, %s934_s21 }
  0x91   :  { %427 = vrot.lane.b32.xlu1 %v353_v28, %s934_s21  ;;  %429 = vrot.lane.b32.xlu0 %v354_v29, %s934_s21 }
  0x95   :  { %431 = vrot.lane.b32.xlu1 %v355_v32, %s934_s21  ;;  %433 = vrot.lane.b32.xlu0 %v356_v33, %s934_s21 }
  0x99   :  { %435 = vrot.lane.b32.xlu1 %v357_v36, %s934_s21  ;;  %437 = vrot.lane.b32.xlu0 %v358_v37, %s934_s21  ;;  %v312_v37 = vmul.f32 %v955_v3, %v1010_v18 }
  0x9d   :  { %439 = vrot.lane.b32.xlu1 %v359_v40, %s934_s21  ;;  %441 = vrot.lane.b32.xlu0 %v360_v41, %s934_s21  ;;  %v313_v40 = vmul.f32 %v955_v3, %v1015_v19 }
  0xa1   :  { %443 = vrot.lane.b32.xlu1 %v361_v44, %s934_s21  ;;  %445 = vrot.lane.b32.xlu0 %v362_v45, %s934_s21 }
  0xa5   :  { %447 = vrot.lane.b32.xlu1 %v363_v48, %s934_s21  ;;  %449 = vrot.lane.b32.xlu0 %v364_v49, %s934_s21  ;;  %v314_v49 = vmul.f32 %v955_v3, %v1026_v22 }
  0xa9   :  { %451 = vrot.lane.b32.xlu1 %v365_v52, %s934_s21  ;;  %453 = vrot.lane.b32.xlu0 %v366_v53, %s934_s21  ;;  %v315_v52 = vmul.f32 %v955_v3, %v1031_v23 }
  0xad   :  { %455 = vrot.lane.b32.xlu1 %v367_v56, %s934_s21  ;;  %457 = vrot.lane.b32.xlu0 %v368_v57, %s934_s21 }
  0xb1   :  { %459 = vrot.lane.b32.xlu1 %v369_v60, %s934_s21  ;;  %461 = vrot.lane.b32.xlu0 %v370_v61, %s934_s21  ;;  %v316_v61 = vmul.f32 %v955_v3, %v1042_v26 }
  0xb5   :  { %463 = vrot.lane.b32.xlu1 %v371_v0, %s934_s21  ;;  %465 = vrot.lane.b32.xlu0 %v372_v1, %s934_s21  ;;  %v317_v0 = vmul.f32 %v955_v3, %v1047_v27 }
  0xb9   :  { %467 = vrot.lane.b32.xlu1 %v373_v8, %s934_s21  ;;  %469 = vrot.lane.b32.xlu0 %v374_v9, %s934_s21 }
  0xef   :  { %v410_v16 = vpop.permute.xlu1 %409  ;;  %v408_v17 = vpop.permute.xlu0 %407 }
  0xf0   :  { %v504_v7 = vsub.f32 %v307_v12, %v410_v16  ;;  %v569_v24 = vadd.f32 %v410_v16, %v307_v12  ;;  %v503_v25 = vsub.f32 %v306_v13, %v408_v17  ;;  %v568_v28 = vadd.f32 %v408_v17, %v306_v13 }
  0xf1   :  { %v318_v13 = vmul.f32 %v955_v3, %v1058_v30  ;;  %v319_v16 = vmul.f32 %v955_v3, %v1063_v31 }
  0xf2   :  { %537 = vst.msk [vmem:[%s1869_s2 + $0x8] sm:$0xff] %vm535_vm1, %v504_v7  ;;  %536 = vst.msk [vmem:[%s1869_s2] sm:$0xff] %vm535_vm1, %v503_v25  ;;  %634 = vrot.lane.b32.xlu0 %v569_v24, %s933_s12  ;;  %632 = vrot.lane.b32.xlu1 %v568_v28, %s933_s12  ;;  %v320_v24 = vmul.f32 %v955_v3, %v1074_v34  ;;  %v321_v25 = vmul.f32 %v955_v3, %v1079_v35 }
  0xf3   :  { %v412_v5 = vpop.permute.xlu1 %411  ;;  %v414_v6 = vpop.permute.xlu0 %413 }
  0xf4   :  { %v505_v29 = vsub.f32 %v308_v20, %v412_v5  ;;  %v570_v32 = vadd.f32 %v412_v5, %v308_v20  ;;  %v506_v33 = vsub.f32 %v309_v21, %v414_v6  ;;  %v571_v36 = vadd.f32 %v414_v6, %v309_v21 }
  0xf6   :  { %538 = vst.msk [vmem:[%s1869_s2 + $0x10] sm:$0xff] %vm535_vm1, %v505_v29  ;;  %539 = vst.msk [vmem:[%s1869_s2 + $0x18] sm:$0xff] %vm535_vm1, %v506_v33  ;;  %638 = vrot.lane.b32.xlu0 %v571_v36, %s933_s12  ;;  %636 = vrot.lane.b32.xlu1 %v570_v32, %s933_s12  ;;  %v323_v29 = vmul.f32 %v955_v3, %v1095_v39 }
  0xf7   :  { %v416_v14 = vpop.permute.xlu1 %415  ;;  %v418_v15 = vpop.permute.xlu0 %417  ;;  %v14_v39 = vld [vmem:[%s1870_s0 + $0x8] sm:$0xff] }
  0xf8   :  { %v507_v41 = vsub.f32 %v310_v10, %v416_v14  ;;  %v572_v44 = vadd.f32 %v416_v14, %v310_v10  ;;  %v508_v45 = vsub.f32 %v311_v11, %v418_v15  ;;  %v573_v48 = vadd.f32 %v418_v15, %v311_v11 }
  0xf9   :  { %v322_v11 = vmul.f32 %v955_v3, %v1090_v38  ;;  %v13_v38 = vld [vmem:[%s1870_s0] sm:$0xff] }
  0xfa   :  { %540 = vst.msk [vmem:[%s1869_s2 + $0x20] sm:$0xff] %vm535_vm1, %v507_v41  ;;  %541 = vst.msk [vmem:[%s1869_s2 + $0x28] sm:$0xff] %vm535_vm1, %v508_v45  ;;  %642 = vrot.lane.b32.xlu0 %v573_v48, %s933_s12  ;;  %640 = vrot.lane.b32.xlu1 %v572_v44, %s933_s12  ;;  %v325_v41 = vmul.f32 %v955_v3, %v1111_v43  ;;  %v769_v48 = vmul.f32 -1.442695, %v13_v38 }
  0xfb   :  { %v420_v18 = vpop.permute.xlu1 %419  ;;  %v422_v19 = vpop.permute.xlu0 %421  ;;  %v15_v44 = vld [vmem:[%s1870_s0 + $0x10] sm:$0xff]  ;;  %v16_v45 = vld [vmem:[%s1870_s0 + $0x18] sm:$0xff]  ;;  %v18_v43 = vld [vmem:[%s1870_s0 + $0x28] sm:$0xff] }
  0xfc   :  { %v509_v53 = vsub.f32 %v312_v37, %v420_v18  ;;  %v574_v56 = vadd.f32 %v420_v18, %v312_v37  ;;  %v510_v57 = vsub.f32 %v313_v40, %v422_v19  ;;  %v575_v60 = vadd.f32 %v422_v19, %v313_v40 }
  0xfd   :  { %v324_v40 = vmul.f32 %v955_v3, %v1106_v42  ;;  %v17_v42 = vld [vmem:[%s1870_s0 + $0x20] sm:$0xff]  ;;  %804 = vpow2.f32 %v769_v48  ;;  %v332_v48 = vmul.f32 %v955_v3, %v1170_v58 }
  0xfe   :  { %542 = vst.msk [vmem:[%s1869_s2 + $0x30] sm:$0xff] %vm535_vm1, %v509_v53  ;;  %543 = vst.msk [vmem:[%s1869_s2 + $0x38] sm:$0xff] %vm535_vm1, %v510_v57  ;;  %646 = vrot.lane.b32.xlu0 %v575_v60, %s933_s12  ;;  %644 = vrot.lane.b32.xlu1 %v574_v56, %s933_s12  ;;  %v770_v53 = vmul.f32 -1.442695, %v14_v39  ;;  %v771_v56 = vmul.f32 -1.442695, %v15_v44 }
  0xff   :  { %v424_v22 = vpop.permute.xlu1 %423  ;;  %v426_v23 = vpop.permute.xlu0 %425  ;;  %v772_v57 = vmul.f32 -1.442695, %v16_v45 }
 0x100   :  { %v511_v1 = vsub.f32 %v314_v49, %v424_v22  ;;  %v576_v8 = vadd.f32 %v424_v22, %v314_v49  ;;  %v512_v9 = vsub.f32 %v315_v52, %v426_v23  ;;  %v577_v12 = vadd.f32 %v426_v23, %v315_v52 }
 0x101   :  { %v326_v23 = vmul.f32 %v955_v3, %v1122_v46  ;;  %806 = vpow2.f32 %v770_v53  ;;  %v21_v46 = vld [vmem:[%s1870_s0 + $0x40] sm:$0xff] }
 0x102   :  { %544 = vst.msk [vmem:[%s1869_s2 + $0x40] sm:$0xff] %vm535_vm1, %v511_v1  ;;  %545 = vst.msk [vmem:[%s1869_s2 + $0x48] sm:$0xff] %vm535_vm1, %v512_v9  ;;  %650 = vrot.lane.b32.xlu0 %v577_v12, %s933_s12  ;;  %648 = vrot.lane.b32.xlu1 %v576_v8, %s933_s12  ;;  %v773_v1 = vmul.f32 -1.442695, %v17_v42  ;;  %808 = vpow2.f32 %v771_v56 }
 0x103   :  { %v428_v26 = vpop.permute.xlu1 %427  ;;  %v430_v27 = vpop.permute.xlu0 %429  ;;  %810 = vpow2.f32 %v772_v57  ;;  %v29_v57 = vld [vmem:[%s1870_s0 + $0x80] sm:$0xff] }
 0x104   :  { %v513_v17 = vsub.f32 %v316_v61, %v428_v26  ;;  %v578_v20 = vadd.f32 %v428_v26, %v316_v61  ;;  %v514_v21 = vsub.f32 %v317_v0, %v430_v27  ;;  %v579_v7 = vadd.f32 %v430_v27, %v317_v0  ;;  %v19_v0 = vld [vmem:[%s1870_s0 + $0x30] sm:$0xff]  ;;  %v20_v27 = vld [vmem:[%s1870_s0 + $0x38] sm:$0xff] }
 0x105   :  { %v327_v61 = vmul.f32 %v955_v3, %v1127_v47  ;;  %v775_v47 = vmul.f32 -1.442695, %v19_v0  ;;  %812 = vpow2.f32 %v773_v1  ;;  %v334_v1 = vmul.f32 %v955_v3, %v1186_v62 }
 0x106   :  { %546 = vst.msk [vmem:[%s1869_s2 + $0x50] sm:$0xff] %vm535_vm1, %v513_v17  ;;  %547 = vst.msk [vmem:[%s1869_s2 + $0x58] sm:$0xff] %vm535_vm1, %v514_v21  ;;  %654 = vrot.lane.b32.xlu0 %v579_v7, %s933_s12  ;;  %652 = vrot.lane.b32.xlu1 %v578_v20, %s933_s12  ;;  %v328_v20 = vmul.f32 %v955_v3, %v1138_v50  ;;  %v329_v21 = vmul.f32 %v955_v3, %v1143_v51 }
 0x107   :  { %v432_v30 = vpop.permute.xlu1 %431  ;;  %v434_v31 = vpop.permute.xlu0 %433  ;;  %v22_v7 = vld [vmem:[%s1870_s0 + $0x48] sm:$0xff]  ;;  %v24_v50 = vld [vmem:[%s1870_s0 + $0x58] sm:$0xff] }
 0x108   :  { %v515_v28 = vsub.f32 %v318_v13, %v432_v30  ;;  %v580_v5 = vadd.f32 %v432_v30, %v318_v13  ;;  %v516_v6 = vsub.f32 %v319_v16, %v434_v31  ;;  %v581_v10 = vadd.f32 %v434_v31, %v319_v16 }
 0x109   :  { %v774_v13 = vmul.f32 -1.442695, %v18_v43  ;;  %v776_v30 = vmul.f32 -1.442695, %v20_v27  ;;  %v778_v51 = vmul.f32 -1.442695, %v22_v7 }
 0x10a   :  { %548 = vst.msk [vmem:[%s1869_s2 + $0x60] sm:$0xff] %vm535_vm1, %v515_v28  ;;  %549 = vst.msk [vmem:[%s1869_s2 + $0x68] sm:$0xff] %vm535_vm1, %v516_v6  ;;  %658 = vrot.lane.b32.xlu0 %v581_v10, %s933_s12  ;;  %656 = vrot.lane.b32.xlu1 %v580_v5, %s933_s12  ;;  %v777_v6 = vmul.f32 -1.442695, %v21_v46 }
 0x10b   :  { %v436_v34 = vpop.permute.xlu1 %435  ;;  %v438_v35 = vpop.permute.xlu0 %437  ;;  %v23_v5 = vld [vmem:[%s1870_s0 + $0x50] sm:$0xff]  ;;  %814 = vpow2.f32 %v774_v13 }
 0x10c   :  { %v517_v32 = vsub.f32 %v320_v24, %v436_v34  ;;  %v582_v33 = vadd.f32 %v436_v34, %v320_v24  ;;  %v518_v36 = vsub.f32 %v321_v25, %v438_v35  ;;  %v583_v14 = vadd.f32 %v438_v35, %v321_v25 }
 0x10d   :  { %816 = vpow2.f32 %v775_v47  ;;  %v330_v35 = vmul.f32 %v955_v3, %v1154_v54 }
 0x10e   :  { %550 = vst.msk [vmem:[%s1869_s2 + $0x70] sm:$0xff] %vm535_vm1, %v517_v32  ;;  %551 = vst.msk [vmem:[%s1869_s2 + $0x78] sm:$0xff] %vm535_vm1, %v518_v36  ;;  %662 = vrot.lane.b32.xlu0 %v583_v14, %s933_s12  ;;  %660 = vrot.lane.b32.xlu1 %v582_v33, %s933_s12  ;;  %818 = vpow2.f32 %v776_v30  ;;  %v779_v32 = vmul.f32 -1.442695, %v23_v5  ;;  %v1418_v33 = vpop.eup %804 }
 0x10f   :  { %v440_v15 = vpop.permute.xlu1 %439  ;;  %v442_v37 = vpop.permute.xlu0 %441  ;;  %820 = vpow2.f32 %v777_v6 }
 0x110   :  { %v519_v18 = vsub.f32 %v322_v11, %v440_v15  ;;  %v584_v19 = vadd.f32 %v440_v15, %v322_v11  ;;  %v520_v49 = vsub.f32 %v323_v29, %v442_v37  ;;  %v585_v52 = vadd.f32 %v442_v37, %v323_v29  ;;  %v25_v29 = vld [vmem:[%s1870_s0 + $0x60] sm:$0xff]  ;;  %v26_v15 = vld [vmem:[%s1870_s0 + $0x68] sm:$0xff]  ;;  %v1423_v54 = vpop.eup %806  ;;  %v27_v37 = vld [vmem:[%s1870_s0 + $0x70] sm:$0xff] }
 0x111   :  { %v331_v11 = vmul.f32 %v955_v3, %v1159_v55  ;;  %v780_v55 = vmul.f32 -1.442695, %v24_v50  ;;  %822 = vpow2.f32 %v778_v51 }
 0x112   :  { %552 = vst.msk [vmem:[%s1869_s2 + $0x80] sm:$0xff] %vm535_vm1, %v519_v18  ;;  %553 = vst.msk [vmem:[%s1869_s2 + $0x88] sm:$0xff] %vm535_vm1, %v520_v49  ;;  %666 = vrot.lane.b32.xlu0 %v585_v52, %s933_s12  ;;  %664 = vrot.lane.b32.xlu1 %v584_v19, %s933_s12  ;;  %v333_v18 = vmul.f32 %v955_v3, %v1175_v59  ;;  %824 = vpow2.f32 %v779_v32  ;;  %v782_v49 = vmul.f32 -1.442695, %v26_v15  ;;  %v783_v59 = vmul.f32 -1.442695, %v27_v37 }
 0x113   :  { %v444_v60 = vpop.permute.xlu1 %443  ;;  %v446_v22 = vpop.permute.xlu0 %445  ;;  %v28_v19 = vld [vmem:[%s1870_s0 + $0x78] sm:$0xff]  ;;  %826 = vpow2.f32 %v780_v55 }
 0x114   :  { %v521_v8 = vsub.f32 %v324_v40, %v444_v60  ;;  %v586_v9 = vadd.f32 %v444_v60, %v324_v40  ;;  %v522_v12 = vsub.f32 %v325_v41, %v446_v22  ;;  %v587_v26 = vadd.f32 %v446_v22, %v325_v41  ;;  %v1438_v41 = vpop.eup %808  ;;  %v30_v60 = vld [vmem:[%s1870_s0 + $0x88] sm:$0xff] }
 0x115   :  { %v781_v40 = vmul.f32 -1.442695, %v25_v29  ;;  %v1447_v52 = vpop.eup %810  ;;  %v784_v22 = vmul.f32 -1.442695, %v28_v19 }
 0x116   :  { %554 = vst.msk [vmem:[%s1869_s2 + $0x90] sm:$0xff] %vm535_vm1, %v521_v8  ;;  %555 = vst.msk [vmem:[%s1869_s2 + $0x98] sm:$0xff] %vm535_vm1, %v522_v12  ;;  %670 = vrot.lane.b32.xlu0 %v587_v26, %s933_s12  ;;  %668 = vrot.lane.b32.xlu1 %v586_v9, %s933_s12  ;;  %v1452_v58 = vpop.eup %812  ;;  %v335_v8 = vmul.f32 %v955_v3, %v1191_v63  ;;  %v785_v12 = vmul.f32 -1.442695, %v29_v57  ;;  %v786_v63 = vmul.f32 -1.442695, %v30_v60 }
 0x117   :  { %v448_v16 = vpop.permute.xlu1 %447  ;;  %v450_v17 = vpop.permute.xlu0 %449  ;;  %828 = vpow2.f32 %v781_v40  ;;  %v31_v9 = vld [vmem:[%s1870_s0 + $0x90] sm:$0xff] }
 0x118   :  { %v523_v31 = vsub.f32 %v326_v23, %v448_v16  ;;  %v588_v24 = vadd.f32 %v448_v16, %v326_v23  ;;  %v524_v25 = vsub.f32 %v327_v61, %v450_v17  ;;  %v589_v28 = vadd.f32 %v450_v17, %v327_v61  ;;  %v1467_v23 = vpop.eup %814  ;;  %v32_v16 = vld [vmem:[%s1870_s0 + $0x98] sm:$0xff]  ;;  %v33_v17 = vld [vmem:[%s1870_s0 + $0xa0] sm:$0xff] }
 0x119   :  { %830 = vpow2.f32 %v782_v49  ;;  %v1476_v26 = vpop.eup %816  ;;  %v41_v49 = vld [vmem:[%s1870_s0 + $0xe0] sm:$0xff] }
 0x11a   :  { %556 = vst.msk [vmem:[%s1869_s2 + $0xa0] sm:$0xff] %vm535_vm1, %v523_v31  ;;  %557 = vst.msk [vmem:[%s1869_s2 + $0xa8] sm:$0xff] %vm535_vm1, %v524_v25  ;;  %674 = vrot.lane.b32.xlu0 %v589_v28, %s933_s12  ;;  %672 = vrot.lane.b32.xlu1 %v588_v24, %s933_s12  ;;  %v1481_v62 = vpop.eup %818  ;;  %832 = vpow2.f32 %v783_v59  ;;  %v336_v31 = vmul.f32 %v955_v3, %v1202_v2  ;;  %v337_v24 = vmul.f32 %v955_v3, %v1207_v4 }
 0x11b   :  { %v452_v10 = vpop.permute.xlu1 %451  ;;  %v454_v34 = vpop.permute.xlu0 %453  ;;  %834 = vpow2.f32 %v784_v22  ;;  %v34_v25 = vld [vmem:[%s1870_s0 + $0xa8] sm:$0xff]  ;;  %v788_v28 = vmul.f32 -1.442695, %v32_v16  ;;  %v36_v3 = vld [vmem:[%s1870_s0 + $0xb8] sm:$0xff]  ;;  %v789_v4 = vmul.f32 -1.442695, %v33_v17 }
 0x11c   :  { %v525_v36 = vsub.f32 %v328_v20, %v452_v10  ;;  %v590_v14 = vadd.f32 %v452_v10, %v328_v20  ;;  %v526_v38 = vsub.f32 %v329_v21, %v454_v34  ;;  %v591_v39 = vadd.f32 %v454_v34, %v329_v21  ;;  %v1496_v21 = vpop.eup %820  ;;  %v35_v34 = vld [vmem:[%s1870_s0 + $0xb0] sm:$0xff] }
 0x11d   :  { %v787_v20 = vmul.f32 -1.442695, %v31_v9  ;;  %836 = vpow2.f32 %v785_v12  ;;  %v1505_v5 = vpop.eup %822  ;;  %v43_v59 = vld [vmem:[%s1870_s0 + $0xf0] sm:$0xff] }
 0x11e   :  { %558 = vst.msk [vmem:[%s1869_s2 + $0xb0] sm:$0xff] %vm535_vm1, %v525_v36  ;;  %559 = vst.msk [vmem:[%s1869_s2 + $0xb8] sm:$0xff] %vm535_vm1, %v526_v38  ;;  %678 = vrot.lane.b32.xlu0 %v591_v39, %s933_s12  ;;  %676 = vrot.lane.b32.xlu1 %v590_v14, %s933_s12  ;;  %v1513_v2 = vpop.eup %824  ;;  %838 = vpow2.f32 %v786_v63  ;;  %v791_v38 = vmul.f32 -1.442695, %v35_v34  ;;  %v792_v39 = vmul.f32 -1.442695, %v36_v3 }
 0x11f   :  { %v456_v44 = vpop.permute.xlu1 %455  ;;  %v458_v45 = vpop.permute.xlu0 %457  ;;  %840 = vpow2.f32 %v787_v20  ;;  %v38_v14 = vld [vmem:[%s1870_s0 + $0xc8] sm:$0xff]  ;;  %v799_v9 = vmul.f32 -1.442695, %v43_v59  ;;  %v143_v63 = vadd.f32 1.0, %v1438_v41  ;;  %v144_v20 = vadd.f32 1.0, %v1447_v52 }
 0x120   :  { %v527_v42 = vsub.f32 %v330_v35, %v456_v44  ;;  %v592_v53 = vadd.f32 %v456_v44, %v330_v35  ;;  %v528_v43 = vsub.f32 %v331_v11, %v458_v45  ;;  %v593_v56 = vadd.f32 %v458_v45, %v331_v11  ;;  %v37_v35 = vld [vmem:[%s1870_s0 + $0xc0] sm:$0xff]  ;;  %v1528_v29 = vpop.eup %826  ;;  %v39_v45 = vld [vmem:[%s1870_s0 + $0xd0] sm:$0xff] }
 0x121   :  { %v790_v11 = vmul.f32 -1.442695, %v34_v25  ;;  %842 = vpow2.f32 %v788_v28  ;;  %v1533_v15 = vpop.eup %828  ;;  %v793_v19 = vmul.f32 -1.442695, %v37_v35  ;;  %v148_v25 = vadd.f32 1.0, %v1481_v62 }
 0x122   :  { %560 = vst.msk [vmem:[%s1869_s2 + $0xc0] sm:$0xff] %vm535_vm1, %v527_v42  ;;  %561 = vst.msk [vmem:[%s1869_s2 + $0xc8] sm:$0xff] %vm535_vm1, %v528_v43  ;;  %682 = vrot.lane.b32.xlu0 %v593_v56, %s933_s12  ;;  %680 = vrot.lane.b32.xlu1 %v592_v53, %s933_s12  ;;  %844 = vpow2.f32 %v789_v4  ;;  %v794_v42 = vmul.f32 -1.442695, %v38_v14  ;;  %v795_v56 = vmul.f32 -1.442695, %v39_v45 }
 0x123   :  { %v460_v61 = vpop.permute.xlu1 %459  ;;  %v462_v0 = vpop.permute.xlu0 %461  ;;  %846 = vpow2.f32 %v790_v11  ;;  %v42_v43 = vld [vmem:[%s1870_s0 + $0xe8] sm:$0xff]  ;;  %v152_v62 = vadd.f32 1.0, %v1528_v29 }
 0x124   :  { %v529_v27 = vsub.f32 %v332_v48, %v460_v61  ;;  %v594_v13 = vadd.f32 %v460_v61, %v332_v48  ;;  %v530_v46 = vsub.f32 %v333_v18, %v462_v0  ;;  %v595_v47 = vadd.f32 %v462_v0, %v333_v18  ;;  %v1538_v48 = vpop.eup %830  ;;  %v40_v18 = vld [vmem:[%s1870_s0 + $0xd8] sm:$0xff] }
 0x125   :  { %v1556_v53 = vpop.eup %832  ;;  %848 = vpow2.f32 %v791_v38  ;;  %v796_v60 = vmul.f32 -1.442695, %v40_v18  ;;  %v44_v61 = vld [vmem:[%s1870_s0 + $0xf8] sm:$0xff]  ;;  %v797_v0 = vmul.f32 -1.442695, %v41_v49 }
 0x126   :  { %562 = vst.msk [vmem:[%s1869_s2 + $0xd0] sm:$0xff] %vm535_vm1, %v529_v27  ;;  %563 = vst.msk [vmem:[%s1869_s2 + $0xd8] sm:$0xff] %vm535_vm1, %v530_v46  ;;  %686 = vrot.lane.b32.xlu0 %v595_v47, %s933_s12  ;;  %684 = vrot.lane.b32.xlu1 %v594_v13, %s933_s12  ;;  %v835_v57 = vpop.eup %834  ;;  %850 = vpow2.f32 %v792_v39  ;;  %v800_v27 = vmul.f32 -1.442695, %v44_v61  ;;  %v141_v46 = vadd.f32 1.0, %v1418_v33  ;;  %v142_v47 = vadd.f32 1.0, %v1423_v54 }
 0x127   :  { %v464_v7 = vpop.permute.xlu1 %463  ;;  %v466_v30 = vpop.permute.xlu0 %465  ;;  %852 = vpow2.f32 %v793_v19  ;;  %v146_v33 = vadd.f32 1.0, %v1467_v23  ;;  %v147_v54 = vadd.f32 1.0, %v1476_v26  ;;  %v150_v23 = vadd.f32 1.0, %v1505_v5 }
 0x128   :  { %v531_v6 = vsub.f32 %v334_v1, %v464_v7  ;;  %v596_v50 = vadd.f32 %v464_v7, %v334_v1  ;;  %v532_v51 = vsub.f32 %v335_v8, %v466_v30  ;;  %v597_v10 = vadd.f32 %v466_v30, %v335_v8  ;;  %v837_v22 = vpop.eup %836 }
 0x129   :  { %854 = vpow2.f32 %v794_v42  ;;  %v798_v1 = vmul.f32 -1.442695, %v42_v43  ;;  %v839_v8 = vpop.eup %838  ;;  %v145_v30 = vadd.f32 1.0, %v1452_v58  ;;  %v149_v58 = vadd.f32 1.0, %v1496_v21 }
 0x12a   :  { %564 = vst.msk [vmem:[%s1869_s2 + $0xe0] sm:$0xff] %vm535_vm1, %v531_v6  ;;  %565 = vst.msk [vmem:[%s1869_s2 + $0xe8] sm:$0xff] %vm535_vm1, %v532_v51  ;;  %690 = vrot.lane.b32.xlu0 %v597_v10, %s933_s12  ;;  %688 = vrot.lane.b32.xlu1 %v596_v50, %s933_s12  ;;  %856 = vpow2.f32 %v795_v56  ;;  %v841_v12 = vpop.eup %840  ;;  %v151_v26 = vadd.f32 1.0, %v1513_v2  ;;  %v153_v21 = vadd.f32 1.0, %v1533_v15  ;;  %v154_v5 = vadd.f32 1.0, %v1538_v48 }
 0x12b   :  { %v468_v32 = vpop.permute.xlu1 %467  ;;  %v470_v36 = vpop.permute.xlu0 %469  ;;  %858 = vpow2.f32 %v796_v60  ;;  %v155_v3 = vadd.f32 1.0, %v1556_v53  ;;  %v156_v4 = vadd.f32 1.0, %v835_v57  ;;  %v157_v11 = vadd.f32 1.0, %v837_v22 }
 0x12c   :  { %v533_v55 = vsub.f32 %v336_v31, %v468_v32  ;;  %v598_v37 = vadd.f32 %v468_v32, %v336_v31  ;;  %v534_v40 = vsub.f32 %v337_v24, %v470_v36  ;;  %v599_v44 = vadd.f32 %v470_v36, %v337_v24  ;;  %v843_v13 = vpop.eup %842 }
 0x12d   :  { %860 = vpow2.f32 %v797_v0  ;;  %v845_v16 = vpop.eup %844  ;;  %v158_v32 = vadd.f32 1.0, %v839_v8  ;;  %v159_v14 = vadd.f32 1.0, %v841_v12  ;;  %v160_v39 = vadd.f32 1.0, %v843_v13 }
 0x12e   :  { %566 = vst.msk [vmem:[%s1869_s2 + $0xf0] sm:$0xff] %vm535_vm1, %v533_v55  ;;  %567 = vst.msk [vmem:[%s1869_s2 + $0xf8] sm:$0xff] %vm535_vm1, %v534_v40  ;;  %694 = vrot.lane.b32.xlu0 %v599_v44, %s933_s12  ;;  %692 = vrot.lane.b32.xlu1 %v598_v37, %s933_s12  ;;  %862 = vpow2.f32 %v798_v1  ;;  %v847_v17 = vpop.eup %846  ;;  %v161_v55 = vadd.f32 1.0, %v845_v16 }
 0x12f   :  { %864 = vpow2.f32 %v799_v9  ;;  %v1571_v7 = vpop.eup %848  ;;  %v162_v40 = vadd.f32 1.0, %v847_v17 }
 0x130   :  { %866 = vpow2.f32 %v800_v27  ;;  %v1574_v31 = vpop.eup %850  ;;  %v163_v45 = vadd.f32 1.0, %v1571_v7 }
 0x131   :  { %868 = vrcp.f32 %v141_v46  ;;  %v1577_v24 = vpop.eup %852  ;;  %v164_v18 = vadd.f32 1.0, %v1574_v31 }
 0x132   :  { %870 = vrcp.f32 %v142_v47  ;;  %v165_v49 = vadd.f32 1.0, %v1577_v24 }
 0x133   :  { %872 = vrcp.f32 %v143_v63  ;;  %v1580_v41 = vpop.eup %854 }
 0x134   :  { %874 = vrcp.f32 %v144_v20  ;;  %v1583_v52 = vpop.eup %856  ;;  %v166_v53 = vadd.f32 1.0, %v1580_v41 }
 0x135   :  { %876 = vrcp.f32 %v145_v30  ;;  %v1586_v28 = vpop.eup %858  ;;  %v167_v56 = vadd.f32 1.0, %v1583_v52 }
 0x136   :  { %878 = vrcp.f32 %v146_v33  ;;  %v168_v59 = vadd.f32 1.0, %v1586_v28 }
 0x137   :  { %v1589_v6 = vpop.eup %860  ;;  %880 = vrcp.f32 %v147_v54 }
 0x138   :  { %v1592_v50 = vpop.eup %862  ;;  %882 = vrcp.f32 %v148_v25  ;;  %v169_v22 = vadd.f32 1.0, %v1589_v6 }
 0x139   :  { %v1595_v51 = vpop.eup %864  ;;  %884 = vrcp.f32 %v149_v58  ;;  %v170_v0 = vadd.f32 1.0, %v1592_v50 }
 0x13a   :  { %v1598_v10 = vpop.eup %866  ;;  %886 = vrcp.f32 %v150_v23  ;;  %v171_v8 = vadd.f32 1.0, %v1595_v51 }
 0x13b   :  { %v869_v34 = vpop.eup %868  ;;  %888 = vrcp.f32 %v151_v26  ;;  %v172_v12 = vadd.f32 1.0, %v1598_v10 }
 0x13c   :  { %v871_v2 = vpop.eup %870  ;;  %890 = vrcp.f32 %v152_v62  ;;  %238 = vst.msk [vmem:[%s1871_s3] sm:$0xff] %vm237_vm2, %v869_v34 }
 0x13d   :  { %v873_v35 = vpop.eup %872  ;;  %892 = vrcp.f32 %v153_v21  ;;  %239 = vst.msk [vmem:[%s1871_s3 + $0x8] sm:$0xff] %vm237_vm2, %v871_v2 }
 0x13e   :  { %v875_v29 = vpop.eup %874  ;;  %894 = vrcp.f32 %v154_v5  ;;  %240 = vst.msk [vmem:[%s1871_s3 + $0x10] sm:$0xff] %vm237_vm2, %v873_v35 }
 0x13f   :  { %v877_v36 = vpop.eup %876  ;;  %896 = vrcp.f32 %v155_v3  ;;  %241 = vst.msk [vmem:[%s1871_s3 + $0x18] sm:$0xff] %vm237_vm2, %v875_v29 }
 0x140   :  { %v879_v38 = vpop.eup %878  ;;  %898 = vrcp.f32 %v156_v4  ;;  %242 = vst.msk [vmem:[%s1871_s3 + $0x20] sm:$0xff] %vm237_vm2, %v877_v36 }
 0x141   :  { %v881_v15 = vpop.eup %880  ;;  %900 = vrcp.f32 %v157_v11  ;;  %243 = vst.msk [vmem:[%s1871_s3 + $0x28] sm:$0xff] %vm237_vm2, %v879_v38 }
 0x142   :  { %v883_v37 = vpop.eup %882  ;;  %902 = vrcp.f32 %v158_v32  ;;  %244 = vst.msk [vmem:[%s1871_s3 + $0x30] sm:$0xff] %vm237_vm2, %v881_v15 }
 0x143   :  { %v885_v44 = vpop.eup %884  ;;  %904 = vrcp.f32 %v159_v14  ;;  %245 = vst.msk [vmem:[%s1871_s3 + $0x38] sm:$0xff] %vm237_vm2, %v883_v37 }
 0x144   :  { %v887_v48 = vpop.eup %886  ;;  %906 = vrcp.f32 %v160_v39  ;;  %246 = vst.msk [vmem:[%s1871_s3 + $0x40] sm:$0xff] %vm237_vm2, %v885_v44 }
 0x145   :  { %v889_v19 = vpop.eup %888  ;;  %908 = vrcp.f32 %v161_v55  ;;  %247 = vst.msk [vmem:[%s1871_s3 + $0x48] sm:$0xff] %vm237_vm2, %v887_v48 }
 0x146   :  { %v891_v42 = vpop.eup %890  ;;  %910 = vrcp.f32 %v162_v40  ;;  %248 = vst.msk [vmem:[%s1871_s3 + $0x50] sm:$0xff] %vm237_vm2, %v889_v19 }
 0x147   :  { %v893_v43 = vpop.eup %892  ;;  %912 = vrcp.f32 %v163_v45  ;;  %249 = vst.msk [vmem:[%s1871_s3 + $0x58] sm:$0xff] %vm237_vm2, %v891_v42 }
 0x148   :  { %v895_v57 = vpop.eup %894  ;;  %914 = vrcp.f32 %v164_v18  ;;  %250 = vst.msk [vmem:[%s1871_s3 + $0x60] sm:$0xff] %vm237_vm2, %v893_v43 }
 0x149   :  { %v897_v60 = vpop.eup %896  ;;  %916 = vrcp.f32 %v165_v49  ;;  %251 = vst.msk [vmem:[%s1871_s3 + $0x68] sm:$0xff] %vm237_vm2, %v895_v57 }
 0x14a   :  { %v899_v61 = vpop.eup %898  ;;  %918 = vrcp.f32 %v166_v53  ;;  %252 = vst.msk [vmem:[%s1871_s3 + $0x70] sm:$0xff] %vm237_vm2, %v897_v60 }
 0x14b   :  { %v901_v1 = vpop.eup %900  ;;  %920 = vrcp.f32 %v167_v56  ;;  %253 = vst.msk [vmem:[%s1871_s3 + $0x78] sm:$0xff] %vm237_vm2, %v899_v61 }
 0x14c   :  { %v903_v9 = vpop.eup %902  ;;  %922 = vrcp.f32 %v168_v59  ;;  %254 = vst.msk [vmem:[%s1871_s3 + $0x80] sm:$0xff] %vm237_vm2, %v901_v1 }
 0x14d   :  { %v905_v27 = vpop.eup %904  ;;  %924 = vrcp.f32 %v169_v22  ;;  %255 = vst.msk [vmem:[%s1871_s3 + $0x88] sm:$0xff] %vm237_vm2, %v903_v9 }
 0x14e   :  { %v907_v13 = vpop.eup %906  ;;  %926 = vrcp.f32 %v170_v0  ;;  %256 = vst.msk [vmem:[%s1871_s3 + $0x90] sm:$0xff] %vm237_vm2, %v905_v27 }
 0x14f   :  { %v909_v46 = vpop.eup %908  ;;  %928 = vrcp.f32 %v171_v8  ;;  %257 = vst.msk [vmem:[%s1871_s3 + $0x98] sm:$0xff] %vm237_vm2, %v907_v13 }
 0x150   :  { %v911_v47 = vpop.eup %910  ;;  %930 = vrcp.f32 %v172_v12  ;;  %258 = vst.msk [vmem:[%s1871_s3 + $0xa0] sm:$0xff] %vm237_vm2, %v909_v46 }
 0x151   :  { %v913_v16 = vpop.eup %912  ;;  %259 = vst.msk [vmem:[%s1871_s3 + $0xa8] sm:$0xff] %vm237_vm2, %v911_v47 }
 0x152   :  { %v915_v63 = vpop.eup %914  ;;  %260 = vst.msk [vmem:[%s1871_s3 + $0xb0] sm:$0xff] %vm237_vm2, %v913_v16 }
 0x153   :  { %v917_v17 = vpop.eup %916  ;;  %261 = vst.msk [vmem:[%s1871_s3 + $0xb8] sm:$0xff] %vm237_vm2, %v915_v63 }
 0x154   :  { %v919_v20 = vpop.eup %918  ;;  %262 = vst.msk [vmem:[%s1871_s3 + $0xc0] sm:$0xff] %vm237_vm2, %v917_v17 }
 0x155   :  { %v921_v7 = vpop.eup %920  ;;  %263 = vst.msk [vmem:[%s1871_s3 + $0xc8] sm:$0xff] %vm237_vm2, %v919_v20 }
 0x156   :  { %v923_v30 = vpop.eup %922  ;;  %264 = vst.msk [vmem:[%s1871_s3 + $0xd0] sm:$0xff] %vm237_vm2, %v921_v7 }
 0x157   :  { %v925_v31 = vpop.eup %924  ;;  %265 = vst.msk [vmem:[%s1871_s3 + $0xd8] sm:$0xff] %vm237_vm2, %v923_v30 }
 0x158   :  { %v927_v33 = vpop.eup %926  ;;  %266 = vst.msk [vmem:[%s1871_s3 + $0xe0] sm:$0xff] %vm237_vm2, %v925_v31 }
 0x159   :  { %v929_v24 = vpop.eup %928  ;;  %267 = vst.msk [vmem:[%s1871_s3 + $0xe8] sm:$0xff] %vm237_vm2, %v927_v33 }
 0x15a   :  { %v931_v54 = vpop.eup %930  ;;  %268 = vst.msk [vmem:[%s1871_s3 + $0xf0] sm:$0xff] %vm237_vm2, %v929_v24 }
 0x15b   :  { %269 = vst.msk [vmem:[%s1871_s3 + $0xf8] sm:$0xff] %vm237_vm2, %v931_v54 }
 0x164   :  { %v635_v41 = vpop.permute.xlu0 %634  ;;  %v633_v25 = vpop.permute.xlu1 %632 }
 0x165   :  { %730 = vst.msk [vmem:[%s1869_s2 + $0x8] sm:$0xff] %vm728_vm3, %v635_v41  ;;  %729 = vst.msk [vmem:[%s1869_s2] sm:$0xff] %vm728_vm3, %v633_v25 }
 0x168   :  { %v639_v52 = vpop.permute.xlu0 %638  ;;  %v637_v58 = vpop.permute.xlu1 %636 }
 0x169   :  { %732 = vst.msk [vmem:[%s1869_s2 + $0x18] sm:$0xff] %vm728_vm3, %v639_v52  ;;  %731 = vst.msk [vmem:[%s1869_s2 + $0x10] sm:$0xff] %vm728_vm3, %v637_v58 }
 0x16c   :  { %v643_v28 = vpop.permute.xlu0 %642  ;;  %v641_v23 = vpop.permute.xlu1 %640 }
 0x16d   :  { %734 = vst.msk [vmem:[%s1869_s2 + $0x28] sm:$0xff] %vm728_vm3, %v643_v28  ;;  %733 = vst.msk [vmem:[%s1869_s2 + $0x20] sm:$0xff] %vm728_vm3, %v641_v23 }
 0x170   :  { %v647_v6 = vpop.permute.xlu0 %646  ;;  %v645_v26 = vpop.permute.xlu1 %644 }
 0x171   :  { %736 = vst.msk [vmem:[%s1869_s2 + $0x38] sm:$0xff] %vm728_vm3, %v647_v6  ;;  %735 = vst.msk [vmem:[%s1869_s2 + $0x30] sm:$0xff] %vm728_vm3, %v645_v26 }
 0x174   :  { %v651_v50 = vpop.permute.xlu0 %650  ;;  %v649_v62 = vpop.permute.xlu1 %648 }
 0x175   :  { %738 = vst.msk [vmem:[%s1869_s2 + $0x48] sm:$0xff] %vm728_vm3, %v651_v50  ;;  %737 = vst.msk [vmem:[%s1869_s2 + $0x40] sm:$0xff] %vm728_vm3, %v649_v62 }
 0x178   :  { %v655_v51 = vpop.permute.xlu0 %654  ;;  %v653_v21 = vpop.permute.xlu1 %652 }
 0x179   :  { %740 = vst.msk [vmem:[%s1869_s2 + $0x58] sm:$0xff] %vm728_vm3, %v655_v51  ;;  %739 = vst.msk [vmem:[%s1869_s2 + $0x50] sm:$0xff] %vm728_vm3, %v653_v21 }
 0x17c   :  { %v659_v10 = vpop.permute.xlu0 %658  ;;  %v657_v5 = vpop.permute.xlu1 %656 }
 0x17d   :  { %742 = vst.msk [vmem:[%s1869_s2 + $0x68] sm:$0xff] %vm728_vm3, %v659_v10  ;;  %741 = vst.msk [vmem:[%s1869_s2 + $0x60] sm:$0xff] %vm728_vm3, %v657_v5 }
 0x180   :  { %v663_v34 = vpop.permute.xlu0 %662  ;;  %v661_v3 = vpop.permute.xlu1 %660 }
 0x181   :  { %744 = vst.msk [vmem:[%s1869_s2 + $0x78] sm:$0xff] %vm728_vm3, %v663_v34  ;;  %743 = vst.msk [vmem:[%s1869_s2 + $0x70] sm:$0xff] %vm728_vm3, %v661_v3 }
 0x184   :  { %v667_v2 = vpop.permute.xlu0 %666  ;;  %v665_v4 = vpop.permute.xlu1 %664 }
 0x185   :  { %746 = vst.msk [vmem:[%s1869_s2 + $0x88] sm:$0xff] %vm728_vm3, %v667_v2  ;;  %745 = vst.msk [vmem:[%s1869_s2 + $0x80] sm:$0xff] %vm728_vm3, %v665_v4 }
 0x188   :  { %v671_v35 = vpop.permute.xlu0 %670  ;;  %v669_v11 = vpop.permute.xlu1 %668 }
 0x189   :  { %748 = vst.msk [vmem:[%s1869_s2 + $0x98] sm:$0xff] %vm728_vm3, %v671_v35  ;;  %747 = vst.msk [vmem:[%s1869_s2 + $0x90] sm:$0xff] %vm728_vm3, %v669_v11 }
 0x18c   :  { %v675_v29 = vpop.permute.xlu0 %674  ;;  %v673_v32 = vpop.permute.xlu1 %672 }
 0x18d   :  { %750 = vst.msk [vmem:[%s1869_s2 + $0xa8] sm:$0xff] %vm728_vm3, %v675_v29  ;;  %749 = vst.msk [vmem:[%s1869_s2 + $0xa0] sm:$0xff] %vm728_vm3, %v673_v32 }
 0x190   :  { %v679_v36 = vpop.permute.xlu0 %678  ;;  %v677_v14 = vpop.permute.xlu1 %676 }
 0x191   :  { %752 = vst.msk [vmem:[%s1869_s2 + $0xb8] sm:$0xff] %vm728_vm3, %v679_v36  ;;  %751 = vst.msk [vmem:[%s1869_s2 + $0xb0] sm:$0xff] %vm728_vm3, %v677_v14 }
 0x194   :  { %v683_v38 = vpop.permute.xlu0 %682  ;;  %v681_v39 = vpop.permute.xlu1 %680 }
 0x195   :  { %754 = vst.msk [vmem:[%s1869_s2 + $0xc8] sm:$0xff] %vm728_vm3, %v683_v38  ;;  %753 = vst.msk [vmem:[%s1869_s2 + $0xc0] sm:$0xff] %vm728_vm3, %v681_v39 }
 0x198   :  { %v687_v15 = vpop.permute.xlu0 %686  ;;  %v685_v55 = vpop.permute.xlu1 %684 }
 0x199   :  { %756 = vst.msk [vmem:[%s1869_s2 + $0xd8] sm:$0xff] %vm728_vm3, %v687_v15  ;;  %755 = vst.msk [vmem:[%s1869_s2 + $0xd0] sm:$0xff] %vm728_vm3, %v685_v55 }
 0x19c   :  { %v691_v37 = vpop.permute.xlu0 %690  ;;  %v689_v40 = vpop.permute.xlu1 %688 }
 0x19d   :  { %758 = vst.msk [vmem:[%s1869_s2 + $0xe8] sm:$0xff] %vm728_vm3, %v691_v37  ;;  %757 = vst.msk [vmem:[%s1869_s2 + $0xe0] sm:$0xff] %vm728_vm3, %v689_v40 }
 0x1a0   :  { %v695_v44 = vpop.permute.xlu0 %694  ;;  %v693_v45 = vpop.permute.xlu1 %692 }
 0x1a1   :  { %760 = vst.msk [vmem:[%s1869_s2 + $0xf8] sm:$0xff] %vm728_vm3, %v695_v44  ;;  %759 = vst.msk [vmem:[%s1869_s2 + $0xf0] sm:$0xff] %vm728_vm3, %v693_v45 }

</bundles_post_ra>
